<compile_context>
chip_gen: v7x
topology: tpu7x:2x2x1
jax: 0.10.0
libtpu: 0.0.40
codegen_flags: <defaults>
</compile_context>

<pallas_src>
import functools

import jax
import jax.numpy as jnp
from jax.experimental import pallas as pl
from jax.experimental.pallas import tpu as pltpu


def _clip_activation_kernel(x_ref, p_ref, o_ref):
    # x_ref: (row_tile, lane_tile)   rows = flattened (n, c), lanes = flattened (h, w)
    # p_ref: (row_tile, 4)  fp32     columns = [x1, x2, y1, slopes] per row
    x = x_ref[...].astype(jnp.float32)
    p = p_ref[...]
    x1 = p[:, 0:1]
    x2 = p[:, 1:2]
    y1 = p[:, 2:3]
    s = p[:, 3:4]
    # Exact original formula: slopes * (relu(x - x1) - relu(x - x2)) + y1
    res = s * (jnp.maximum(x - x1, 0.0) - jnp.maximum(x - x2, 0.0)) + y1
    o_ref[...] = res.astype(o_ref.dtype)


def _round_up(v, m):
    return ((v + m - 1) // m) * m


def _select_tiles(R, L, itemsize, target_block_bytes, max_row_tile=2048):
    """Pick (row_tile, lane_tile) for a ~target_block_bytes activation block.

    row_tile is either R (full) or a multiple of the sublane pack (8 for 32-bit,
    16 for 16-bit dtypes); lane_tile is either L (full) or a multiple of 128.
    """
    sub_align = 8 if itemsize >= 4 else (16 if itemsize == 2 else 32)
    target_elems = max(1, target_block_bytes // itemsize)

    # Lane tile: full L when one sublane group of it fits the budget, otherwise
    # the largest multiple of 128 that does.
    padded_L = _round_up(L, 128)
    if padded_L * sub_align <= target_elems:
        lane_tile = L
    else:
        lane_tile = max(128, min((target_elems // sub_align) // 128,
                                 padded_L // 128) * 128)
        if lane_tile >= L:
            lane_tile = L

    # Row tile: fill the remaining budget. Cap so the lane-padded (row_tile, 128)
    # fp32 param block (x32 its logical size) stays small even double-buffered.
    eff_lane = _round_up(lane_tile, 128)
    rows_budget = max(sub_align, (target_elems // eff_lane) // sub_align * sub_align)
    rows_budget = min(rows_budget, max_row_tile)
    row_tile = R if rows_budget >= R else rows_budget

    # v7x megacore: keep >= 2 parallel grid steps when the whole array would
    # otherwise be a single block.
    if row_tile >= R and lane_tile >= L:
        half_rows = _round_up(pl.cdiv(R, 2), sub_align)
        half_lanes = _round_up(pl.cdiv(L, 2), 128)
        if half_rows < R:
            row_tile = half_rows
        elif half_lanes < L:
            lane_tile = half_lanes

    return row_tile, lane_tile


@functools.partial(jax.jit, static_argnames=("target_block_bytes",))
def clip_activation_forward(x, x1, x2, y1, slopes, *, target_block_bytes=2 * 1024 * 1024):
    """x: NCHW array (fp32/bf16/fp16). x1/x2/y1/slopes: shape (1, C, 1, 1)."""
    N, C, H, W = x.shape
    R = N * C
    L = H * W
    itemsize = jnp.dtype(x.dtype).itemsize

    # torch.nan_to_num(slopes) from the module's __init__ (tiny glue op).
    slopes = jnp.nan_to_num(slopes)

    # Free view of the contiguous NCHW buffer -- no transpose, no dtype copy.
    xk = x.reshape(R, L)

    # Per-row params packed into one (R, 4) fp32 array: [x1, x2, y1, slopes].
    def per_row(p):
        p = jnp.asarray(p, jnp.float32).reshape(1, -1)
        return jnp.broadcast_to(jnp.broadcast_to(p, (1, C)), (N, C)).reshape(R, 1)

    params = jnp.concatenate(
        [per_row(x1), per_row(x2), per_row(y1), per_row(slopes)], axis=1
    )

    row_tile, lane_tile = _select_tiles(R, L, itemsize, target_block_bytes)
    row_blocks = pl.cdiv(R, row_tile)
    lane_blocks = pl.cdiv(L, lane_tile)

    # Rows-outer whenever rows have >1 block (param block index constant across
    # the inner lane loop -> no re-DMA).  Lanes-outer only when row_blocks == 1,
    # where params are constant anyway and lanes provide the parallel steps.
    if row_blocks > 1 or lane_blocks == 1:
        grid = (row_blocks, lane_blocks)
        x_map = lambda r, l: (r, l)
        p_map = lambda r, l: (r, 0)
    else:
        grid = (lane_blocks, row_blocks)
        x_map = lambda l, r: (r, l)
        p_map = lambda l, r: (r, 0)

    # TODO(synk): for very small H*W (< 128 lanes) a lane-padded / (N, C*H*W)
    # relayout would avoid masked partial stores; not worth it at these shapes.
    out = pl.pallas_call(
        _clip_activation_kernel,
        out_shape=jax.ShapeDtypeStruct((R, L), x.dtype),
        grid_spec=pltpu.PrefetchScalarGridSpec(
            num_scalar_prefetch=0,
            grid=grid,
            in_specs=[
                pl.BlockSpec((row_tile, lane_tile), x_map),   # activations (native dtype)
                pl.BlockSpec((row_tile, 4), p_map),           # packed per-row params (fp32)
            ],
            out_specs=pl.BlockSpec((row_tile, lane_tile), x_map),
        ),
        compiler_params=pltpu.CompilerParams(
            dimension_semantics=("parallel", "parallel")),
    )(xk, params)

    # Free view back to NCHW.
    return out.reshape(N, C, H, W)


def _reference_forward(x, x1, x2, y1, slopes):
    slopes = jnp.nan_to_num(slopes)
    return (slopes * (jax.nn.relu(x - x1) - jax.nn.relu(x - x2)) + y1).astype(x.dtype)


if __name__ == "__main__":
    key = jax.random.PRNGKey(0)
    kx, k1, k2, ky, ks = jax.random.split(key, 5)

    N, C, H, W = 2, 4, 16, 16
    x = jax.random.normal(kx, (N, C, H, W), dtype=jnp.float32)

    # Per-channel parameters, PyTorch-style broadcast shapes (1, C, 1, 1).
    x1 = -jnp.abs(jax.random.normal(k1, (1, C, 1, 1), dtype=jnp.float32))             # left knot
    x2 = x1 + jnp.abs(jax.random.normal(k2, (1, C, 1, 1), dtype=jnp.float32)) + 0.5   # right knot > x1
    y1 = jax.random.normal(ky, (1, C, 1, 1), dtype=jnp.float32)
    slopes = jax.random.normal(ks, (1, C, 1, 1), dtype=jnp.float32)

    out = jax.block_until_ready(clip_activation_forward(x, x1, x2, y1, slopes))
    ref = _reference_forward(x, x1, x2, y1, slopes)
    assert out.shape == (N, C, H, W) and out.dtype == x.dtype
    assert jnp.allclose(out, ref, atol=1e-6, rtol=1e-6), "fp32 mismatch vs reference"

    # Exercise the native-dtype (bf16) I/O path as well.
    xb = x.astype(jnp.bfloat16)
    out_b = jax.block_until_ready(clip_activation_forward(xb, x1, x2, y1, slopes))
    ref_b = _reference_forward(xb, x1, x2, y1, slopes)
    assert out_b.dtype == jnp.bfloat16
    assert jnp.allclose(out_b.astype(jnp.float32), ref_b.astype(jnp.float32),
                        atol=2e-2, rtol=2e-2), "bf16 mismatch vs reference"

    print("KERNEL_OK")
</pallas_src>

<mosaic_0001>
module attributes {stable_mosaic.version = 11 : i64} {
  func.func @_clip_activation_kernel(%arg0: i32, %arg1: i32, %arg2: memref<8x128xf32, #tpu.memory_space<vmem>>, %arg3: memref<8x4xf32, #tpu.memory_space<vmem>>, %arg4: memref<8x128xf32, #tpu.memory_space<vmem>>) attributes {dimension_semantics = [#tpu.dimension_semantics<parallel>, #tpu.dimension_semantics<parallel>], iteration_bounds = array<i64: 2, 1>, scalar_prefetch = 0 : i64, scratch_operands = 0 : i64, tpu.core_type = #tpu.core_type<tc>, window_params = [{transform_indices = @transform_0, window_bounds = array<i64: 8, 128>}, {transform_indices = @transform_1, window_bounds = array<i64: 8, 4>}, {transform_indices = @transform_2, window_bounds = array<i64: 8, 128>}]} {
    %c0 = arith.constant 0 : index
    %c0_0 = arith.constant 0 : index
    %0 = vector.load %arg2[%c0, %c0_0] : memref<8x128xf32, #tpu.memory_space<vmem>>, vector<8x128xf32>
    %c0_1 = arith.constant 0 : index
    %c0_2 = arith.constant 0 : index
    %1 = vector.load %arg3[%c0_1, %c0_2] : memref<8x4xf32, #tpu.memory_space<vmem>>, vector<8x4xf32>
    %2 = vector.extract_strided_slice %1 {offsets = [0, 0], sizes = [8, 1], strides = [1, 1]} : vector<8x4xf32> to vector<8x1xf32>
    %3 = vector.extract_strided_slice %1 {offsets = [0, 1], sizes = [8, 1], strides = [1, 1]} : vector<8x4xf32> to vector<8x1xf32>
    %4 = vector.extract_strided_slice %1 {offsets = [0, 2], sizes = [8, 1], strides = [1, 1]} : vector<8x4xf32> to vector<8x1xf32>
    %5 = vector.extract_strided_slice %1 {offsets = [0, 3], sizes = [8, 1], strides = [1, 1]} : vector<8x4xf32> to vector<8x1xf32>
    %6 = vector.broadcast %2 : vector<8x1xf32> to vector<8x128xf32>
    %7 = arith.subf %0, %6 : vector<8x128xf32>
    %cst = arith.constant 0.000000e+00 : f32
    %8 = vector.broadcast %cst : f32 to vector<8x128xf32>
    %9 = arith.maximumf %7, %8 : vector<8x128xf32>
    %10 = vector.broadcast %3 : vector<8x1xf32> to vector<8x128xf32>
    %11 = arith.subf %0, %10 : vector<8x128xf32>
    %cst_3 = arith.constant 0.000000e+00 : f32
    %12 = vector.broadcast %cst_3 : f32 to vector<8x128xf32>
    %13 = arith.maximumf %11, %12 : vector<8x128xf32>
    %14 = arith.subf %9, %13 : vector<8x128xf32>
    %15 = vector.broadcast %5 : vector<8x1xf32> to vector<8x128xf32>
    %16 = arith.mulf %15, %14 : vector<8x128xf32>
    %17 = vector.broadcast %4 : vector<8x1xf32> to vector<8x128xf32>
    %18 = arith.addf %16, %17 : vector<8x128xf32>
    %c0_4 = arith.constant 0 : index
    %c0_5 = arith.constant 0 : index
    %19 = vector.load %arg4[%c0_4, %c0_5] : memref<8x128xf32, #tpu.memory_space<vmem>>, vector<8x128xf32>
    tpu.vector_store %arg4[%c0_4, %c0_5], %18 {strides = array<i32>} : memref<8x128xf32, #tpu.memory_space<vmem>>, vector<8x128xf32>,
    return
  }
  func.func @transform_0(%arg0: i32, %arg1: i32) -> (i32, i32) {
    %c0_i32 = arith.constant 0 : i32
    return %arg1, %arg0 : i32, i32
  }
  func.func @transform_1(%arg0: i32, %arg1: i32) -> (i32, i32) {
    %c0_i32 = arith.constant 0 : i32
    %c0_i32_0 = arith.constant 0 : i32
    return %arg1, %c0_i32 : i32, i32
  }
  func.func @transform_2(%arg0: i32, %arg1: i32) -> (i32, i32) {
    %c0_i32 = arith.constant 0 : i32
    return %arg1, %arg0 : i32, i32
  }
}

</mosaic_0001>

<bundles_post_ra>
// kernel: clip_activation_forward.1
= control target key start
LH: loop header
LB: loop body
LE: loop exit
PB: predicated region body
PF: predicated region fallthrough
CT: control target
= control target key end

     0   :  { %s404_s9 = smov 0   ;;  %s406_s10 = smov 0   ;;  %s440_s0 = inlined_call_operand.vmem [shape: f32[8,256], index: 0, kind: input, shape index: {}]   ;;  %s441_s1 = inlined_call_operand.vmem [shape: f32[8,4], index: 1, kind: input, shape index: {}]   ;;  %s442_s2 = inlined_call_operand.vmem [shape: f32[8,256], index: 2, kind: output, shape index: {}]  }
   0x1   :  { %s408_s11 = smov 0  }
   0x2 LB: > { %s24_s12 = sadd.s32 1, %s379_s10  ;;  %p323_p0 = scmp.ge.s32.totalorder %s383_s11, 1  ;;  %s383_s11 = sphi %s408_s11, %s12_s11   ;;  %s379_s10 = sphi %s406_s10, %s444_s10   ;;  %s375_s9 = sphi %s404_s9, %s443_s9  }
   0x3   : > { %p26_p1 = scmp.ge.s32.totalorder %s24_s12, 2  ;;  %p140_p2 = scmp.lt.s32.totalorder %s383_s11, 3 }
   0x5   : > { %s446_s12 = smov (%p26_p1, %s24_s12), 0  ;;  %p141_p3 = pnand %p323_p0, %p140_p2 }
   0x6   : > { %v193_v0 = vld [vmem:[%s441_s1] sm:$0xff] (!%p141_p3)  ;;  %v385_v1 = vmov (!%p141_p3), 0   ;;  %v386_v2 = vmov (!%p141_p3), 3   ;;  %v387_v3 = vmov (!%p141_p3), 1   ;;  %v388_v4 = vmov (!%p141_p3), 2   ;;  %p174_p4 = scmp.lt.s32.totalorder (!%p141_p3), %s375_s9, 1 }
   0x7   : > { %144 = sbr.rel (%p141_p3) target bundleno = 152 (0x98), region = 28  ;;  %356 = vset.pattern.permute.xlu0 (!%p141_p3), %v385_v1  ;;  %358 = vset.pattern.permute.xlu1 (!%p141_p3), %v386_v2 }
   0x8   : > { %196 = vperm.xlu0 (!%p141_p3), %356, %v193_v0   ;;  %209 = vperm.xlu1 (!%p141_p3), %358, %v193_v0  }
   0xc   : > { %357 = vset.pattern.permute.xlu0 (!%p141_p3), %v387_v3  ;;  %359 = vset.pattern.permute.xlu1 (!%p141_p3), %v388_v4 }
   0xd   : > { %202 = vperm.xlu0 (!%p141_p3), %357, %v193_v0   ;;  %214 = vperm.xlu1 (!%p141_p3), %359, %v193_v0  }
   0xe   : > { %s448_s9 = smov (!%p174_p4, %s375_s9), 1 }
   0xf   : > { %s324_s15 = sshll.u32 %s448_s9, 3 }
  0x10   : > { %s179_s18 = scalar_lea.vmem %s440_s0, %s324_s15  ;;  %s191_s21 = scalar_lea.vmem %s442_s2, %s324_s15 }
  0x11   : > { %360 = vset.pattern.permute.xlu0 %v388_v4  ;;  %v192_v6 = vld [vmem:[%s179_s18] sm:$0xff] }
  0x87   : > { %v197_v5 = vpop.permute.xlu0 %196  ;;  %v210_v9 = vpop.permute.xlu1 %209 }
  0x88   : > { %v199_v7 = vsub.f32 %v192_v6, %v197_v5 }
  0x8a   : > { %v200_v11 = vmax.f32 %v199_v7, 0.0 }
  0x8c   : > { %v203_v8 = vpop.permute.xlu0 %202  ;;  %v215_v14 = vpop.permute.xlu1 %214 }
  0x8d   : > { %v205_v10 = vsub.f32 %v192_v6, %v203_v8 }
  0x8f   : > { %v206_v12 = vmax.f32 %v205_v10, 0.0 }
  0x91   : > { %v207_v13 = vsub.f32 %v200_v11, %v206_v12 }
  0x93   : > { %v212_v15 = vmul.f32 %v210_v9, %v207_v13 }
  0x95   : > { %v217_v16 = vadd.f32 %v215_v14, %v212_v15 }
  0x97   : > { %218 = vst [vmem:[%s191_s21] sm:$0xff] %v217_v16 }
  0x98 PF: > { %s12_s11 = sadd.s32 1, %s383_s11   ;;  %s443_s9 = smov %s379_s10 }
  0x99   : > { %p9_p5 = scmp.ge.s32.totalorder %s12_s11, 4   ;;  %s444_s10 = smov %s446_s12 }
  0x9b   :  { %11 = sbr.rel (!%p9_p5) target bundleno = 2 (0x2), region = 61 }

</bundles_post_ra>
